<compile_context>
chip_gen: v5e
topology: v5e:2x2
jax: 0.10.0
libtpu: 0.0.40
codegen_flags: <defaults>
</compile_context>

<pallas_src>
import functools

import jax
import jax.numpy as jnp
from jax.experimental import pallas as pl
from jax.experimental.pallas import tpu as pltpu

LN_EPS = 1e-5                              # torch.nn.LayerNorm default eps
_TARGET_BLOCK_BYTES = 8 * 1024 * 1024      # per-stream per-step DMA target (2-8 MiB)


@functools.lru_cache(maxsize=1)
def _vmem_limit():
    """Per-generation scoped-VMEM limit: ~75% of physical VMEM, capped at 100 MiB.
    v5e/v6e (128 MiB physical) -> 96 MiB; v7x (64 MiB) -> 48 MiB."""
    cap = None
    try:
        cap = getattr(pltpu.get_tpu_info(), "vmem_capacity_bytes", None)
    except Exception:
        cap = None
    if not cap:
        cap = 64 * 1024 * 1024             # conservative fallback (v7x-sized)
    return min((3 * int(cap)) // 4, 100 * 1024 * 1024)


def _pick_tm(n_rows, d, itemsize, n_streams):
    """Row-tile size: double-buffered windows for `n_streams` (N, D) arrays plus
    ~4 f32 temporaries must fit in ~75% of the scoped VMEM limit, and each
    stream's block targets <= ~8 MiB per grid step.  Multiple of 8 sublanes
    (or the full row count)."""
    budget = (3 * _vmem_limit()) // 4
    per_row = d * (2 * n_streams * itemsize + 4 * 4)
    tm = budget // max(per_row, 1)
    tm = min(int(tm), _TARGET_BLOCK_BYTES // max(d * itemsize, 1))
    tm = max(8, (tm // 8) * 8)
    return n_rows if tm >= n_rows else int(tm)


# --------------------------------------------------------------------------
# Fused pass (common path): y = LayerNorm(x) + per-block partial sum |x - prev|
# --------------------------------------------------------------------------
def _ln_delta_kernel(x_ref, prev_ref, gamma_ref, beta_ref, y_ref, part_ref,
                     *, n_rows, tm):
    i = pl.program_id(0)
    x = x_ref[...].astype(jnp.float32)
    diff = jnp.abs(x - prev_ref[...].astype(jnp.float32))

    if n_rows % tm != 0:
        last = pl.num_programs(0) - 1

        @pl.when(i != last)
        def _():
            part_ref[...] = jnp.sum(diff, keepdims=True)

        @pl.when(i == last)
        def _():
            # Only the last block pays for tail-row masking.
            row = jax.lax.broadcasted_iota(jnp.int32, diff.shape, 0) + i * tm
            part_ref[...] = jnp.sum(jnp.where(row < n_rows, diff, 0.0),
                                    keepdims=True)
    else:
        part_ref[...] = jnp.sum(diff, keepdims=True)

    # Speculative plain LayerNorm of x.  Padded tail rows may compute garbage
    # but are never written back to HBM (row-tiled, non-resident output).
    mean = jnp.mean(x, axis=-1, keepdims=True)
    cent = x - mean
    var = jnp.mean(cent * cent, axis=-1, keepdims=True)
    xhat = cent * jax.lax.rsqrt(var + LN_EPS)
    y_ref[...] = (xhat * gamma_ref[...] + beta_ref[...]).astype(y_ref.dtype)


def _ln_delta_fused(x2, prev2, gamma2, beta2, out_dtype):
    n, d = x2.shape
    itemsize = max(x2.dtype.itemsize, prev2.dtype.itemsize,
                   jnp.dtype(out_dtype).itemsize)
    tm = _pick_tm(n, d, itemsize, n_streams=3)     # x read + prev read + y write
    g = pl.cdiv(n, tm)
    y, partials = pl.pallas_call(
        functools.partial(_ln_delta_kernel, n_rows=n, tm=tm),
        grid=(g,),
        in_specs=[
            pl.BlockSpec((tm, d), lambda i: (i, 0)),
            pl.BlockSpec((tm, d), lambda i: (i, 0)),
            pl.BlockSpec((1, d), lambda i: (0, 0)),
            pl.BlockSpec((1, d), lambda i: (0, 0)),
        ],
        out_specs=(
            pl.BlockSpec((tm, d), lambda i: (i, 0)),
            pl.BlockSpec((1, 1), lambda i: (i, 0)),   # parallel per-block partials
        ),
        out_shape=(
            jax.ShapeDtypeStruct((n, d), out_dtype),
            jax.ShapeDtypeStruct((g, 1), jnp.float32),
        ),
        compiler_params=pltpu.CompilerParams(
            dimension_semantics=("parallel",),
            vmem_limit_bytes=_vmem_limit()),
    )(x2, prev2, gamma2, beta2)
    return y, partials


# --------------------------------------------------------------------------
# Plain LayerNorm (init path: no prev, no delta)
# --------------------------------------------------------------------------
def _ln_kernel(x_ref, gamma_ref, beta_ref, y_ref):
    x = x_ref[...].astype(jnp.float32)
    mean = jnp.mean(x, axis=-1, keepdims=True)
    cent = x - mean
    var = jnp.mean(cent * cent, axis=-1, keepdims=True)
    xhat = cent * jax.lax.rsqrt(var + LN_EPS)
    y_ref[...] = (xhat * gamma_ref[...] + beta_ref[...]).astype(y_ref.dtype)


def _layernorm(x2, gamma2, beta2, out_dtype):
    n, d = x2.shape
    tm = _pick_tm(n, d, max(x2.dtype.itemsize, jnp.dtype(out_dtype).itemsize),
                  n_streams=2)
    return pl.pallas_call(
        _ln_kernel,
        grid=(pl.cdiv(n, tm),),
        in_specs=[
            pl.BlockSpec((tm, d), lambda i: (i, 0)),
            pl.BlockSpec((1, d), lambda i: (0, 0)),
            pl.BlockSpec((1, d), lambda i: (0, 0)),
        ],
        out_specs=pl.BlockSpec((tm, d), lambda i: (i, 0)),
        out_shape=jax.ShapeDtypeStruct((n, d), out_dtype),
        compiler_params=pltpu.CompilerParams(
            dimension_semantics=("parallel",),
            vmem_limit_bytes=_vmem_limit()),
    )(x2, gamma2, beta2)


# --------------------------------------------------------------------------
# Fused smoothing + LayerNorm (+ new_prev writeback) -- rare path
# --------------------------------------------------------------------------
def _smooth_ln_kernel(x_ref, prev_ref, gamma_ref, beta_ref, y_ref, newprev_ref):
    xs = (x_ref[...].astype(jnp.float32) + prev_ref[...].astype(jnp.float32)) * 0.5
    newprev_ref[...] = xs.astype(newprev_ref.dtype)
    mean = jnp.mean(xs, axis=-1, keepdims=True)
    cent = xs - mean
    var = jnp.mean(cent * cent, axis=-1, keepdims=True)
    xhat = cent * jax.lax.rsqrt(var + LN_EPS)
    y_ref[...] = (xhat * gamma_ref[...] + beta_ref[...]).astype(y_ref.dtype)


def _smooth_layernorm(x2, prev2, gamma2, beta2, out_dtype):
    n, d = x2.shape
    tm = _pick_tm(n, d, max(x2.dtype.itemsize, jnp.dtype(out_dtype).itemsize),
                  n_streams=4)
    return pl.pallas_call(
        _smooth_ln_kernel,
        grid=(pl.cdiv(n, tm),),
        in_specs=[
            pl.BlockSpec((tm, d), lambda i: (i, 0)),
            pl.BlockSpec((tm, d), lambda i: (i, 0)),
            pl.BlockSpec((1, d), lambda i: (0, 0)),
            pl.BlockSpec((1, d), lambda i: (0, 0)),
        ],
        out_specs=(
            pl.BlockSpec((tm, d), lambda i: (i, 0)),
            pl.BlockSpec((tm, d), lambda i: (i, 0)),
        ),
        out_shape=(
            jax.ShapeDtypeStruct((n, d), out_dtype),
            jax.ShapeDtypeStruct((n, d), out_dtype),
        ),
        compiler_params=pltpu.CompilerParams(
            dimension_semantics=("parallel",),
            vmem_limit_bytes=_vmem_limit()),
    )(x2, prev2, gamma2, beta2)


# --------------------------------------------------------------------------
# Module forward
# --------------------------------------------------------------------------
def risl_forward(x, prev, prev_valid, dps, gamma, beta, threshold=0.9):
    """One RISLModule.forward step.

    Returns (y, new_prev, delta).  The caller threads `new_prev` (with
    prev_valid=True) into the next call, mimicking `self.prev`.
    `prev_valid` must be a host Python/concrete truth value (it mirrors the
    torch module's host-side buffer-state check).  `dps` may be a Python float
    (preferred: enables the copy-free host-level branch, exactly like torch's
    `if dps >= 2.0 and delta > threshold`) or a traced scalar (lax.cond fallback).
    """
    B, S, D = x.shape
    N = B * S
    out_dtype = x.dtype
    x2 = x.reshape(N, D)
    gamma2 = gamma.reshape(1, D).astype(jnp.float32)
    beta2 = beta.reshape(1, D).astype(jnp.float32)

    if not bool(prev_valid):
        # Init step: prev := x, delta = 0, plain LayerNorm (2 HBM streams,
        # no prev read, no delta pass).
        y2 = _layernorm(x2, gamma2, beta2, out_dtype)
        return y2.reshape(B, S, D), x, jnp.zeros((), jnp.float32)

    prev2 = prev.reshape(N, D)

    # Speculative fused pass: y = LN(x) + per-block |x - prev| partial sums.
    y2, partials = _ln_delta_fused(x2, prev2, gamma2, beta2, out_dtype)
    delta = jnp.sum(partials) / jnp.float32(N * D)

    # Smoothing decision.  Host-level (mirrors the torch Python `if`); the
    # common no-smooth path returns the speculative y and x itself as new_prev
    # (zero extra HBM traffic, no lax.cond buffer copies).
    try:
        smooth = bool(dps >= 2.0) and bool(delta > threshold)
    except jax.errors.ConcretizationTypeError:
        smooth = None     # traced decision -> lax.cond fallback

    if smooth is None:
        do_smooth = jnp.logical_and(jnp.asarray(dps, jnp.float32) >= 2.0,
                                    delta > jnp.float32(threshold))

        def _smooth_branch(ops):
            xx, pp, g, b, _ = ops
            return _smooth_layernorm(xx, pp, g, b, out_dtype)

        def _plain_branch(ops):
            xx, pp, g, b, ys = ops
            return ys, xx

        y2, newprev2 = jax.lax.cond(do_smooth, _smooth_branch, _plain_branch,
                                    (x2, prev2, gamma2, beta2, y2))
        return y2.reshape(B, S, D), newprev2.reshape(B, S, D), delta

    if smooth:
        y2, newprev2 = _smooth_layernorm(x2, prev2, gamma2, beta2, out_dtype)
        return y2.reshape(B, S, D), newprev2.reshape(B, S, D), delta

    return y2.reshape(B, S, D), x, delta


# --------------------------------------------------------------------------
# Pure-JAX reference mirroring the PyTorch module semantics
# --------------------------------------------------------------------------
def risl_forward_ref(x, prev, prev_valid, dps, gamma, beta, threshold=0.9):
    if not prev_valid:
        prev = x
        delta = jnp.zeros((), jnp.float32)
    else:
        delta = jnp.mean(jnp.abs(x - prev))
    if dps >= 2.0 and float(delta) > threshold:
        x = (x + prev) / 2.0
    new_prev = x
    mean = jnp.mean(x, axis=-1, keepdims=True)
    var = jnp.mean((x - mean) ** 2, axis=-1, keepdims=True)
    y = (x - mean) / jnp.sqrt(var + LN_EPS) * gamma + beta
    return y, new_prev, delta


if __name__ == "__main__":
    d_model = 32
    B, S = 2, 8

    key = jax.random.PRNGKey(0)
    k1, k2 = jax.random.split(key)
    x1 = jax.random.normal(k1, (B, S, d_model), dtype=jnp.float32)
    # second step input with a large deviation so smoothing triggers
    x2 = x1 + 2.0 * jax.random.normal(k2, (B, S, d_model), dtype=jnp.float32)

    # nn.LayerNorm(d_model) default parameters: weight=1, bias=0
    gamma = jnp.ones((d_model,), jnp.float32)
    beta = jnp.zeros((d_model,), jnp.float32)

    prev0 = jnp.zeros((B, S, d_model), jnp.float32)

    # step 1: prev buffer uninitialized -> init path (plain LN, delta = 0)
    y1, prev1, d1 = risl_forward(x1, prev0, prev_valid=False, dps=2.5,
                                 gamma=gamma, beta=beta)
    # step 2: prev holds x1; dps >= 2, large delta -> smoothing branch fires
    y2, prev2, d2 = risl_forward(x2, prev1, prev_valid=True, dps=2.5,
                                 gamma=gamma, beta=beta)
    # step 3: same inputs, huge threshold -> runtime no-smoothing path
    y3, prev3, d3 = risl_forward(x2, prev1, prev_valid=True, dps=2.5,
                                 gamma=gamma, beta=beta, threshold=10.0)
    jax.block_until_ready((y1, prev1, d1, y2, prev2, d2, y3, prev3, d3))

    # reference checks
    ry1, rprev1, rd1 = risl_forward_ref(x1, prev0, False, 2.5, gamma, beta)
    ry2, rprev2, rd2 = risl_forward_ref(x2, rprev1, True, 2.5, gamma, beta)
    ry3, rprev3, rd3 = risl_forward_ref(x2, rprev1, True, 2.5, gamma, beta,
                                        threshold=10.0)

    assert jnp.allclose(y1, ry1, atol=1e-5), "step1 output mismatch"
    assert jnp.allclose(prev1, rprev1, atol=1e-6), "step1 prev mismatch"
    assert jnp.allclose(d1, rd1, atol=1e-6), "step1 delta mismatch"
    assert jnp.allclose(y2, ry2, atol=1e-5), "step2 output mismatch"
    assert jnp.allclose(prev2, rprev2, atol=1e-6), "step2 prev mismatch"
    assert jnp.allclose(d2, rd2, atol=1e-5), "step2 delta mismatch"
    assert jnp.allclose(y3, ry3, atol=1e-5), "step3 output mismatch"
    assert jnp.allclose(prev3, rprev3, atol=1e-6), "step3 prev mismatch"
    assert jnp.allclose(d3, rd3, atol=1e-5), "step3 delta mismatch"

    print("KERNEL_OK")
</pallas_src>

<mosaic_0001>
module attributes {stable_mosaic.version = 11 : i64} {
  func.func @_ln_kernel(%arg0: i32, %arg1: memref<16x32xf32, #tpu.memory_space<vmem>>, %arg2: memref<1x32xf32, #tpu.memory_space<vmem>>, %arg3: memref<1x32xf32, #tpu.memory_space<vmem>>, %arg4: memref<16x32xf32, #tpu.memory_space<vmem>>) attributes {dimension_semantics = [#tpu.dimension_semantics<parallel>], iteration_bounds = array<i64: 1>, scalar_prefetch = 0 : i64, scratch_operands = 0 : i64, tpu.core_type = #tpu.core_type<tc>, window_params = [{transform_indices = @transform_0, window_bounds = array<i64: 16, 32>}, {pipeline_mode = #tpu.pipeline_mode<synchronous>, transform_indices = @transform_1, window_bounds = array<i64: 1, 32>}, {pipeline_mode = #tpu.pipeline_mode<synchronous>, transform_indices = @transform_2, window_bounds = array<i64: 1, 32>}, {transform_indices = @transform_3, window_bounds = array<i64: 16, 32>}]} {
    %c0 = arith.constant 0 : index
    %c0_0 = arith.constant 0 : index
    %0 = vector.load %arg1[%c0, %c0_0] : memref<16x32xf32, #tpu.memory_space<vmem>>, vector<16x32xf32>
    %cst = arith.constant dense<0.000000e+00> : vector<16xf32>
    %1 = vector.multi_reduction <add>, %0, %cst [1] : vector<16x32xf32> to vector<16xf32>
    %2 = vector.shape_cast %1 : vector<16xf32> to vector<16x1xf32>
    %cst_1 = arith.constant 3.200000e+01 : f32
    %3 = vector.broadcast %cst_1 : f32 to vector<16x1xf32>
    %4 = arith.divf %2, %3 : vector<16x1xf32>
    %5 = vector.broadcast %4 : vector<16x1xf32> to vector<16x32xf32>
    %6 = arith.subf %0, %5 : vector<16x32xf32>
    %7 = arith.mulf %6, %6 : vector<16x32xf32>
    %cst_2 = arith.constant dense<0.000000e+00> : vector<16xf32>
    %8 = vector.multi_reduction <add>, %7, %cst_2 [1] : vector<16x32xf32> to vector<16xf32>
    %9 = vector.shape_cast %8 : vector<16xf32> to vector<16x1xf32>
    %cst_3 = arith.constant 3.200000e+01 : f32
    %10 = vector.broadcast %cst_3 : f32 to vector<16x1xf32>
    %11 = arith.divf %9, %10 : vector<16x1xf32>
    %cst_4 = arith.constant 9.99999974E-6 : f32
    %12 = vector.broadcast %cst_4 : f32 to vector<16x1xf32>
    %13 = arith.addf %11, %12 : vector<16x1xf32>
    %14 = math.rsqrt %13 : vector<16x1xf32>
    %15 = vector.broadcast %14 : vector<16x1xf32> to vector<16x32xf32>
    %16 = arith.mulf %6, %15 : vector<16x32xf32>
    %c0_5 = arith.constant 0 : index
    %c0_6 = arith.constant 0 : index
    %17 = vector.load %arg2[%c0_5, %c0_6] : memref<1x32xf32, #tpu.memory_space<vmem>>, vector<1x32xf32>
    %18 = vector.broadcast %17 : vector<1x32xf32> to vector<16x32xf32>
    %19 = arith.mulf %16, %18 : vector<16x32xf32>
    %c0_7 = arith.constant 0 : index
    %c0_8 = arith.constant 0 : index
    %20 = vector.load %arg3[%c0_7, %c0_8] : memref<1x32xf32, #tpu.memory_space<vmem>>, vector<1x32xf32>
    %21 = vector.broadcast %20 : vector<1x32xf32> to vector<16x32xf32>
    %22 = arith.addf %19, %21 : vector<16x32xf32>
    %c0_9 = arith.constant 0 : index
    %c0_10 = arith.constant 0 : index
    %23 = vector.load %arg4[%c0_9, %c0_10] : memref<16x32xf32, #tpu.memory_space<vmem>>, vector<16x32xf32>
    tpu.vector_store %arg4[%c0_9, %c0_10], %22 {strides = array<i32>} : memref<16x32xf32, #tpu.memory_space<vmem>>, vector<16x32xf32>,
    return
  }
  func.func @transform_0(%arg0: i32) -> (i32, i32) {
    %c0_i32 = arith.constant 0 : i32
    %c0_i32_0 = arith.constant 0 : i32
    return %arg0, %c0_i32 : i32, i32
  }
  func.func @transform_1(%arg0: i32) -> (i32, i32) {
    %c0_i32 = arith.constant 0 : i32
    %c0_i32_0 = arith.constant 0 : i32
    %c0_i32_1 = arith.constant 0 : i32
    return %c0_i32, %c0_i32_0 : i32, i32
  }
  func.func @transform_2(%arg0: i32) -> (i32, i32) {
    %c0_i32 = arith.constant 0 : i32
    %c0_i32_0 = arith.constant 0 : i32
    %c0_i32_1 = arith.constant 0 : i32
    return %c0_i32, %c0_i32_0 : i32, i32
  }
  func.func @transform_3(%arg0: i32) -> (i32, i32) {
    %c0_i32 = arith.constant 0 : i32
    %c0_i32_0 = arith.constant 0 : i32
    return %arg0, %c0_i32 : i32, i32
  }
}

</mosaic_0001>

<bundles_post_ra>
// kernel: tpu_custom_call.1
= control target key start
LH: loop header
LB: loop body
LE: loop exit
PB: predicated region body
PF: predicated region fallthrough
CT: control target
= control target key end

     0   :  { %8 = vsyncpa [#allocation3], 0  ;;  %s275_s0 = inlined_call_operand.hbm [shape: f32[16,32], index: 0, kind: input, shape index: {}]   ;;  %s276_s1 = inlined_call_operand.hbm [shape: f32[1,32], index: 1, kind: input, shape index: {}]   ;;  %s277_s2 = inlined_call_operand.vmem [shape: f32[1,32], index: 2, kind: input, shape index: {}]   ;;  %s278_s3 = inlined_call_operand.hbm [shape: f32[16,32], index: 3, kind: output, shape index: {}]  }
   0x1   :  { %9 = vsyncpa [#allocation6], 0 }
   0x2   :  { %10 = vsyncpa [#allocation4], 0  ;;  %s15_s14 = sshll.u32 %s275_s0, 4  ;;  %s225_s15 = smov [#allocation2]   ;;  %s16_s14 = int_to_ptr.hbm [resolvable:$true] %s15_s14 }
   0x3   :  { %s17_s16 = sshll.u32 %s225_s15, 4  ;;  %s29_s19 = sshll.u32 %s276_s1, 4  ;;  %s18_s16 = int_to_ptr.vmem [resolvable:$true] %s17_s16  ;;  %s30_s19 = int_to_ptr.hbm [resolvable:$true] %s29_s19 }
   0x4   :  { %s226_s20 = smov 128   ;;  %s227_s21 = smov 8  }
   0x5   :  { %23 = dma.hbm_to_vmem [thread:$0]  %s16_s14, 256, %s18_s16, [#allocation3], %s226_s20, %s226_s20, %s227_s21  }
   0x6   :  { %s228_s22 = smov [#allocation5]  }
   0x7   :  { %s31_s23 = sshll.u32 %s228_s22, 4  ;;  %s32_s23 = int_to_ptr.vmem [resolvable:$true] %s31_s23 }
   0x8   :  { %34 = dma.hbm_to_vmem [thread:$0]  %s30_s19, 16, %s32_s23, [#allocation6]  }
   0x9   :  { %219 = dma.done.wait [#allocation3], 256  }
   0xa   :  { %220 = vsyncadd [#allocation3], 4294967040 }
   0xb   :  { %221 = dma.done.wait [#allocation6], 16  }
   0xc   :  { %222 = vsyncadd [#allocation6], 4294967280  ;;  %vm47_vm0 = vcmask 261120   ;;  %v45_v0 = vld [vmem:[#allocation2] sm:$0xff]  ;;  %v46_v2 = vld [vmem:[#allocation2 + $0x8] sm:$0xff]  ;;  %v229_v4 = vmov 32.0  }
   0xd   :  { %v48_v1 = vsel %vm47_vm0, %v45_v0, 0.0  ;;  %v51_v3 = vsel %vm47_vm0, %v46_v2, 0.0  ;;  %141 = vrcp.f32 %v229_v4  ;;  %v139_v35 = vld [vmem:[#allocation5] ss:$0 sm:$0xff]  ;;  %v140_v39 = vld [vmem:[%s277_s2] ss:$0 sm:$0xff] }
   0xe   :  { %49 = vadd.xlane.f32.xlu0 %v48_v1  ;;  %s230_s24 = smov [#allocation7]   ;;  %s119_s28 = sshll.u32 %s278_s3, 4  ;;  %s120_s28 = int_to_ptr.hbm [resolvable:$true] %s119_s28 }
   0xf   :  { %s117_s25 = sshll.u32 %s230_s24, 4  ;;  %s118_s25 = int_to_ptr.vmem [resolvable:$true] %s117_s25 }
  0x13   :  { %v142_v5 = vpop.eup %141 }
  0x14   :  { %v55_v6 = vmul.f32 32.0, %v142_v5  ;;  %vm59_vm1 = vweird.f32 %v142_v5 }
  0x16   :  { %52 = vadd.xlane.f32.xlu0 %v51_v3  ;;  %v56_v7 = vsub.f32 1.0, %v55_v6 }
  0x18   :  { %v57_v8 = vmul.f32 %v142_v5, %v56_v7 }
  0x1a   :  { %v58_v9 = vadd.f32 %v142_v5, %v57_v8 }
  0x1c   :  { %v60_v10 = vsel %vm59_vm1, %v142_v5, %v58_v9 }
  0x81   :  { %v50_v11 = vpop.xlane.xlu0 %49 }
  0x82   :  { %v61_v12 = vmul.f32 %v60_v10, %v50_v11 }
  0x84   :  { %v63_v13 = vsub.f32 %v45_v0, %v61_v12 }
  0x86   :  { %v65_v14 = vmul.f32 %v63_v13, %v63_v13 }
  0x88   :  { %v67_v15 = vsel %vm47_vm0, %v65_v14, 0.0 }
  0x89   :  { %68 = vadd.xlane.f32.xlu1 %v67_v15  ;;  %v53_v16 = vpop.xlane.xlu0 %52 }
  0x8a   :  { %v62_v17 = vmul.f32 %v60_v10, %v53_v16 }
  0x8c   :  { %v64_v18 = vsub.f32 %v46_v2, %v62_v17 }
  0x8e   :  { %v66_v19 = vmul.f32 %v64_v18, %v64_v18 }
  0x90   :  { %v70_v20 = vsel %vm47_vm0, %v66_v19, 0.0 }
  0x91   :  { %71 = vadd.xlane.f32.xlu1 %v70_v20 }
  0xfc   :  { %v69_v21 = vpop.xlane.xlu1 %68 }
  0xfd   :  { %v73_v22 = vmul.f32 %v69_v21, %v60_v10 }
  0xff   :  { %v75_v23 = vadd.f32 1e-05, %v73_v22 }
 0x101   :  { %143 = vrsqrt.f32 %v75_v23  ;;  %vm83_vm3 = vweird.f32 %v75_v23 }
 0x104   :  { %v72_v24 = vpop.xlane.xlu1 %71 }
 0x105   :  { %v74_v25 = vmul.f32 %v72_v24, %v60_v10 }
 0x107   :  { %v144_v26 = vpop.eup %143  ;;  %v76_v27 = vadd.f32 1e-05, %v74_v25 }
 0x108   :  { %v78_v28 = vmul.f32 %v144_v26, %v75_v23  ;;  %vm84_vm2 = vweird.f32 %v144_v26 }
 0x109   :  { %145 = vrsqrt.f32 %v76_v27  ;;  %vm85_vm4 = vmor %vm83_vm3, %vm84_vm2  ;;  %vm93_vm6 = vweird.f32 %v76_v27 }
 0x10a   :  { %v79_v29 = vmul.f32 %v144_v26, %v78_v28 }
 0x10c   :  { %v80_v30 = vmul.f32 0.5, %v79_v29 }
 0x10e   :  { %v81_v31 = vsub.f32 1.5, %v80_v30 }
 0x10f   :  { %v146_v32 = vpop.eup %145 }
 0x110   :  { %v82_v33 = vmul.f32 %v144_v26, %v81_v31  ;;  %v88_v34 = vmul.f32 %v146_v32, %v76_v27  ;;  %vm94_vm5 = vweird.f32 %v146_v32 }
 0x111   :  { %vm95_vm7 = vmor %vm93_vm6, %vm94_vm5 }
 0x112   :  { %v86_v36 = vsel %vm85_vm4, %v144_v26, %v82_v33  ;;  %v89_v37 = vmul.f32 %v146_v32, %v88_v34 }
 0x113   :  { %v97_v38 = vmul.f32 %v86_v36, %v63_v13 }
 0x114   :  { %v90_v40 = vmul.f32 0.5, %v89_v37 }
 0x115   :  { %v103_v41 = vmul.f32 %v139_v35, %v97_v38 }
 0x116   :  { %v91_v42 = vsub.f32 1.5, %v90_v40 }
 0x117   :  { %v109_v43 = vadd.f32 %v140_v39, %v103_v41 }
 0x118   :  { %v92_v44 = vmul.f32 %v146_v32, %v91_v42 }
 0x119   :  { %111 = vst.msk [vmem:[#allocation7] sm:$0xff] %vm47_vm0, %v109_v43 }
 0x11a   :  { %v96_v45 = vsel %vm95_vm7, %v146_v32, %v92_v44 }
 0x11b   :  { %v98_v46 = vmul.f32 %v96_v45, %v64_v18 }
 0x11d   :  { %v104_v47 = vmul.f32 %v139_v35, %v98_v46 }
 0x11f   :  { %v110_v48 = vadd.f32 %v140_v39, %v104_v47 }
 0x121   :  { %112 = vst.msk [vmem:[#allocation7 + $0x8] sm:$0xff] %vm47_vm0, %v110_v48 }
 0x122   :  { %125 = dma.vmem_to_hbm [thread:$0]  %s118_s25, 256, %s120_s28, [#allocation4], %s226_s20, %s226_s20, %s227_s21  }
 0x123   :  { %223 = dma.done.wait [#allocation4], 256  }
 0x124   :  { %224 = vsyncadd [#allocation4], 4294967040 }
 0x125   :  { %130 = vsyncpa [#allocation3], 1 }
 0x126   :  { %131 = vsyncpa [#allocation6], 1 }
 0x127   :  { %132 = vsyncpa [#allocation4], 1 }

</bundles_post_ra>
